<compile_context>
chip_gen: v6e
topology: v6e:2x2x1
jax: 0.10.0
libtpu: 0.0.40
codegen_flags: <defaults>
</compile_context>

<pallas_src>
import functools

import jax
import jax.numpy as jnp
from jax.experimental import pallas as pl
from jax.experimental.pallas import tpu as pltpu

BN_EPS = 1e-5


def _vmem_budgets():
    """(per-block budget bytes, scoped vmem limit bytes), generation-aware."""
    vmem_cap = 64 * 1024 * 1024          # conservative default (v7x per-core)
    try:
        info = pltpu.get_tpu_info()
        vmem_cap = int(getattr(info, "vmem_capacity_bytes", vmem_cap))
    except Exception:
        pass
    if vmem_cap >= 128 * 1024 * 1024:    # v5e / v6e: 128 MiB VMEM
        return 14 * 1024 * 1024, 88 * 1024 * 1024
    return 7 * 1024 * 1024, 44 * 1024 * 1024   # v7x / unknown: 64 MiB VMEM


def _choose_tile(hw, channels, budget_bytes):
    """Largest multiple-of-128 spatial tile with channels*tile*4B <= budget."""
    max_tile = max(budget_bytes // (4 * max(channels, 1)), 128)
    tile = max((max_tile // 128) * 128, 128)
    hw_pad128 = pl.cdiv(hw, 128) * 128
    return min(tile, hw_pad128)


def _pool_sum_kernel(x_ref, o_ref, acc_ref, *, hw, tile, tiles_per_split,
                     needs_mask):
    # x_ref  : (1, C_in, tile)   spatial tile of one image (one split chunk)
    # o_ref  : (1, 1, C_in, 1)   per-(split, image) spatial partial sum
    # acc_ref: (C_in, 1) f32     running sum (VMEM scratch)
    s = pl.program_id(0)
    t = pl.program_id(2)

    @pl.when(t == 0)
    def _init():
        acc_ref[...] = jnp.zeros_like(acc_ref)

    x = x_ref[0].astype(jnp.float32)                       # (C_in, tile)
    if needs_mask:
        # Ragged tail / fully-out-of-range (index-clamped) blocks: OOB lanes
        # are garbage and MUST be zeroed before accumulating.
        start = (s * tiles_per_split + t) * tile
        lane = jax.lax.broadcasted_iota(jnp.int32, x.shape, 1)
        x = jnp.where(lane < (hw - start), x, 0.0)
    # Lane reduce on VPU/XLU (no MXU ones-matmul); hidden under the DMA stream.
    acc_ref[...] += jnp.sum(x, axis=-1, keepdims=True)

    @pl.when(t == pl.num_programs(2) - 1)
    def _finalize():
        o_ref[...] = acc_ref[...][None, None].astype(o_ref.dtype)


def _broadcast_kernel(z_ref, o_ref):
    # z_ref: (1, C_out, 1); o_ref: (1, C_out, tile) lane-dense output tile.
    o_ref[...] = jnp.broadcast_to(z_ref[...], o_ref.shape).astype(o_ref.dtype)


def global_pooling_forward(x, conv_w, bn_gamma, bn_beta, bn_mean, bn_var,
                           *, block_budget_bytes=None):
    """x: (N, C_in, H, W) float32 (NCHW, like PyTorch). Returns (N, C_out, H, W)."""
    n, c_in, h, w = x.shape
    c_out = conv_w.shape[0]
    hw = h * w

    auto_budget, vmem_limit = _vmem_budgets()
    budget = auto_budget if block_budget_bytes is None else block_budget_bytes

    # ---- Fold BatchNorm (inference) into the 1x1 conv ----------------------
    scale = bn_gamma * jax.lax.rsqrt(bn_var + BN_EPS)            # (C_out,)
    w_folded = conv_w.reshape(c_out, c_in) * scale[:, None]      # (C_out, C_in)
    bias = bn_beta - bn_mean * scale                             # (C_out,)

    # ---- Pass A: streaming spatial sum (no input padding) ------------------
    x_flat = x.reshape(n, c_in, hw)
    tile_in = _choose_tile(hw, c_in, budget)
    total_tiles = pl.cdiv(hw, tile_in)
    # Second parallel axis when N == 1 so both TensorCores stream half of x.
    n_split = 2 if (n == 1 and total_tiles >= 2) else 1
    tiles_per_split = pl.cdiv(total_tiles, n_split)
    needs_mask = (n_split * tiles_per_split * tile_in) != hw

    def x_index_map(s, b, t):
        # Clamp so a fully-out-of-range block re-fetches the last valid block
        # (its contribution is masked to zero inside the kernel).
        return (b, 0, jnp.minimum(s * tiles_per_split + t, total_tiles - 1))

    sums = pl.pallas_call(
        functools.partial(_pool_sum_kernel, hw=hw, tile=tile_in,
                          tiles_per_split=tiles_per_split,
                          needs_mask=needs_mask),
        out_shape=jax.ShapeDtypeStruct((n_split, n, c_in, 1), jnp.float32),
        grid_spec=pltpu.PrefetchScalarGridSpec(
            num_scalar_prefetch=0,
            grid=(n_split, n, tiles_per_split),
            in_specs=[pl.BlockSpec((1, c_in, tile_in), x_index_map)],
            out_specs=pl.BlockSpec((1, 1, c_in, 1),
                                   lambda s, b, t: (s, b, 0, 0)),
            scratch_shapes=[pltpu.VMEM((c_in, 1), jnp.float32)]),
        compiler_params=pltpu.CompilerParams(
            dimension_semantics=("parallel", "parallel", "arbitrary"),
            vmem_limit_bytes=vmem_limit),
    )(x_flat)

    # ---- Tiny folded conv + BN + ReLU as one XLA GEMM ----------------------
    pooled = jnp.sum(sums[..., 0], axis=0) * (1.0 / float(hw))   # (N, C_in)
    z = jnp.maximum(pooled @ w_folded.T + bias, 0.0)             # (N, C_out)
    z = z.astype(x.dtype)

    # ---- Pass B: streaming broadcast into exact (N, C_out, H*W) ------------
    # TODO(synk): in a full network, skip this pass and return `z` so XLA can
    # fuse the replication into the consumer; kept to match the module output.
    tile_out = _choose_tile(hw, c_out, budget)
    out_flat = pl.pallas_call(
        _broadcast_kernel,
        out_shape=jax.ShapeDtypeStruct((n, c_out, hw), x.dtype),
        grid_spec=pltpu.PrefetchScalarGridSpec(
            num_scalar_prefetch=0,
            grid=(n, pl.cdiv(hw, tile_out)),
            in_specs=[pl.BlockSpec((1, c_out, 1), lambda b, t: (b, 0, 0))],
            out_specs=pl.BlockSpec((1, c_out, tile_out),
                                   lambda b, t: (b, 0, t))),
        compiler_params=pltpu.CompilerParams(
            dimension_semantics=("parallel", "parallel"),
            vmem_limit_bytes=vmem_limit),
    )(z[:, :, None])

    return out_flat.reshape(n, c_out, h, w)


def _reference(x, conv_w, bn_gamma, bn_beta, bn_mean, bn_var):
    n, c_in, h, w = x.shape
    c_out = conv_w.shape[0]
    pooled = jnp.mean(x, axis=(2, 3))                          # (N, C_in)
    y = pooled @ conv_w.reshape(c_out, c_in).T                 # (N, C_out)
    y = bn_gamma * (y - bn_mean) / jnp.sqrt(bn_var + BN_EPS) + bn_beta
    y = jnp.maximum(y, 0.0)
    return jnp.broadcast_to(y[:, :, None, None], (n, c_out, h, w))


def _make_inputs(key, n, c_in, c_out, h, w):
    k_x, k_w, k_g, k_b, k_m, k_v = jax.random.split(key, 6)
    x = jax.random.normal(k_x, (n, c_in, h, w), dtype=jnp.float32)
    # Conv2d(in, out, 1, bias=False) weight: (C_out, C_in, 1, 1)
    conv_w = (jax.random.normal(k_w, (c_out, c_in, 1, 1), dtype=jnp.float32)
              * (1.0 / float(c_in) ** 0.5))
    # BatchNorm2d(out_channels) inference-mode parameters (deterministic).
    bn_gamma = 1.0 + 0.1 * jax.random.normal(k_g, (c_out,), dtype=jnp.float32)
    bn_beta = 0.1 * jax.random.normal(k_b, (c_out,), dtype=jnp.float32)
    bn_mean = 0.1 * jax.random.normal(k_m, (c_out,), dtype=jnp.float32)
    bn_var = jnp.abs(jax.random.normal(k_v, (c_out,), dtype=jnp.float32)) + 0.5
    return x, conv_w, bn_gamma, bn_beta, bn_mean, bn_var


if __name__ == "__main__":
    key = jax.random.PRNGKey(0)
    k1, k2 = jax.random.split(key)

    # Case 1: primary shapes (N, C_in, H, W) = (2, 4, 16, 16); tile-aligned HW.
    args1 = _make_inputs(k1, 2, 4, 8, 16, 16)
    out1 = jax.block_until_ready(global_pooling_forward(*args1))
    ref1 = _reference(*args1)
    assert out1.shape == ref1.shape
    assert jnp.allclose(out1, ref1, atol=1e-5, rtol=1e-5), "case 1 mismatch"

    # Case 2: N=1 (exercises the 2-way parallel spatial split), ragged HW
    # (13*21 = 273, not a multiple of 128 => in-kernel tail masking, clamped
    # fully-OOB block, masked final output store); tiny block budget forces a
    # multi-tile grid so those paths actually run at this small size.
    args2 = _make_inputs(k2, 1, 8, 16, 13, 21)
    out2 = jax.block_until_ready(
        global_pooling_forward(*args2, block_budget_bytes=4096))
    ref2 = _reference(*args2)
    assert out2.shape == ref2.shape
    assert jnp.allclose(out2, ref2, atol=1e-5, rtol=1e-5), "case 2 mismatch"

    print("KERNEL_OK")
</pallas_src>

<mosaic_0001>
module attributes {stable_mosaic.version = 11 : i64} {
  func.func @_pool_sum_kernel(%arg0: i32, %arg1: i32, %arg2: i32, %arg3: memref<1x4x256xf32, #tpu.memory_space<vmem>>, %arg4: memref<1x1x4x1xf32, #tpu.memory_space<vmem>>, %arg5: memref<4x1xf32, #tpu.memory_space<vmem>>) attributes {dimension_semantics = [#tpu.dimension_semantics<parallel>, #tpu.dimension_semantics<parallel>, #tpu.dimension_semantics<arbitrary>], iteration_bounds = array<i64: 1, 2, 1>, scalar_prefetch = 0 : i64, scratch_operands = 1 : i64, tpu.core_type = #tpu.core_type<tc>, window_params = [{transform_indices = @transform_0, window_bounds = array<i64: 1, 4, 256>}, {transform_indices = @transform_1, window_bounds = array<i64: 1, 1, 4, 1>}]} {
    %c0_i32 = arith.constant 0 : i32
    %0 = arith.cmpi eq, %arg2, %c0_i32 : i32
    %1 = arith.extui %0 : i1 to i32
    %c0_i32_0 = arith.constant 0 : i32
    %2 = arith.cmpi ne, %1, %c0_i32_0 : i32
    scf.if %2 {
      %cst_9 = arith.constant 0.000000e+00 : f32
      %13 = vector.broadcast %cst_9 : f32 to vector<4x1xf32>
      %c0_10 = arith.constant 0 : index
      %c0_11 = arith.constant 0 : index
      %14 = vector.load %arg5[%c0_10, %c0_11] : memref<4x1xf32, #tpu.memory_space<vmem>>, vector<4x1xf32>
      tpu.vector_store %arg5[%c0_10, %c0_11], %13 {strides = array<i32>} : memref<4x1xf32, #tpu.memory_space<vmem>>, vector<4x1xf32>,
    } else {
    }
    %c0 = arith.constant 0 : index
    %c0_1 = arith.constant 0 : index
    %c0_2 = arith.constant 0 : index
    %3 = vector.load %arg3[%c0, %c0_1, %c0_2] : memref<1x4x256xf32, #tpu.memory_space<vmem>>, vector<1x4x256xf32>
    %4 = vector.shape_cast %3 : vector<1x4x256xf32> to vector<4x256xf32>
    %c0_3 = arith.constant 0 : index
    %c0_4 = arith.constant 0 : index
    %5 = vector.load %arg5[%c0_3, %c0_4] : memref<4x1xf32, #tpu.memory_space<vmem>>, vector<4x1xf32>
    %cst = arith.constant dense<0.000000e+00> : vector<4xf32>
    %6 = vector.multi_reduction <add>, %4, %cst [1] : vector<4x256xf32> to vector<4xf32>
    %7 = vector.shape_cast %6 : vector<4xf32> to vector<4x1xf32>
    %8 = arith.addf %5, %7 : vector<4x1xf32>
    %c0_5 = arith.constant 0 : index
    %c0_6 = arith.constant 0 : index
    %9 = vector.load %arg5[%c0_5, %c0_6] : memref<4x1xf32, #tpu.memory_space<vmem>>, vector<4x1xf32>
    tpu.vector_store %arg5[%c0_5, %c0_6], %8 {strides = array<i32>} : memref<4x1xf32, #tpu.memory_space<vmem>>, vector<4x1xf32>,
    %c0_i32_7 = arith.constant 0 : i32
    %10 = arith.cmpi eq, %arg2, %c0_i32_7 : i32
    %11 = arith.extui %10 : i1 to i32
    %c0_i32_8 = arith.constant 0 : i32
    %12 = arith.cmpi ne, %11, %c0_i32_8 : i32
    scf.if %12 {
      %c0_9 = arith.constant 0 : index
      %c0_10 = arith.constant 0 : index
      %13 = vector.load %arg5[%c0_9, %c0_10] : memref<4x1xf32, #tpu.memory_space<vmem>>, vector<4x1xf32>
      %14 = vector.shape_cast %13 : vector<4x1xf32> to vector<1x1x4x1xf32>
      %c0_11 = arith.constant 0 : index
      %c0_12 = arith.constant 0 : index
      %c0_13 = arith.constant 0 : index
      %c0_14 = arith.constant 0 : index
      %15 = vector.load %arg4[%c0_11, %c0_12, %c0_13, %c0_14] : memref<1x1x4x1xf32, #tpu.memory_space<vmem>>, vector<1x1x4x1xf32>
      tpu.vector_store %arg4[%c0_11, %c0_12, %c0_13, %c0_14], %14 {strides = array<i32>} : memref<1x1x4x1xf32, #tpu.memory_space<vmem>>, vector<1x1x4x1xf32>,
    } else {
    }
    return
  }
  func.func @transform_0(%arg0: i32, %arg1: i32, %arg2: i32) -> (i32, i32, i32) {
    %c1_i32 = arith.constant 1 : i32
    %0 = arith.muli %arg0, %c1_i32 : i32
    %1 = arith.addi %0, %arg2 : i32
    %c0_i32 = arith.constant 0 : i32
    %2 = arith.minsi %1, %c0_i32 : i32
    %c0_i32_0 = arith.constant 0 : i32
    %c0_i32_1 = arith.constant 0 : i32
    return %arg1, %c0_i32_0, %2 : i32, i32, i32
  }
  func.func @transform_1(%arg0: i32, %arg1: i32, %arg2: i32) -> (i32, i32, i32, i32) {
    %c0_i32 = arith.constant 0 : i32
    %c0_i32_0 = arith.constant 0 : i32
    %c0_i32_1 = arith.constant 0 : i32
    return %arg0, %arg1, %c0_i32, %c0_i32_0 : i32, i32, i32, i32
  }
}

</mosaic_0001>

<bundles_post_ra>
// kernel: tpu_custom_call.1
= control target key start
LH: loop header
LB: loop body
LE: loop exit
PB: predicated region body
PF: predicated region fallthrough
CT: control target
= control target key end

     0   :  { %6 = vsyncpa [#allocation4], 0  ;;  %s564_s0 = inlined_call_operand.hbm [shape: f32[2,4,256], index: 0, kind: input, shape index: {}]   ;;  %s565_s1 = inlined_call_operand.vmem [shape: f32[1,2,4,1], index: 1, kind: output, shape index: {}]  }
   0x1   :  { %8 = vsyncpa [#allocation4 + $0x1], 0  ;;  %s461_s6 = smov 0   ;;  %s463_s7 = smov 0  }
   0x2   :  { %s465_s8 = smov 0   ;;  %s467_s9 = smov 0  }
   0x3   :  { %s469_s10 = smov 0   ;;  %s471_s11 = smov 0  }
   0x4 LB: > { %s299_s12 = sadd.s32 4294967295, %s447_s11   ;;  %s29_s13 = sadd.s32 1, %s443_s10  ;;  %s447_s11 = sphi %s471_s11, %s14_s11   ;;  %s443_s10 = sphi %s469_s10, %s573_s10   ;;  %s439_s9 = sphi %s467_s9, %s572_s9   ;;  %s435_s8 = sphi %s465_s8, %s571_s8   ;;  %s431_s7 = sphi %s463_s7, %s570_s7   ;;  %s427_s6 = sphi %s461_s6, %s569_s6  }
   0x5   : > { %p31_p0 = scmp.ge.s32.totalorder %s29_s13, 2  ;;  %s48_s14 = sadd.s32 1, %s435_s8 }
   0x6   : > { %p55_p1 = scmp.ne.s32.totalorder %s435_s8, %s431_s7  ;;  %p56_p2 = scmp.eq.s32.totalorder %s447_s11, 0 }
   0x7   : > { %s575_s13 = smov (%p31_p0, %s29_s13), 0  ;;  %p61_p4 = scmp.ne.s32.totalorder %s431_s7, %s427_s6 }
   0x8   : > { %p497_p3 = por %p56_p2, %p55_p1  ;;  %s43_s16 = ssub.s32 %s443_s10, %s575_s13 }
   0x9   : > { %p62_p5 = scmp.eq.s32.totalorder %s299_s12, 0  ;;  %p46_p6 = scmp.eq.s32.totalorder %s43_s16, 0 }
   0xa   : > { %p318_p8 = scmp.lt.s32.totalorder %s447_s11, 2  ;;  %s113_s19 = sand.u32 1, %s435_s8  }
   0xb   : > { %p504_p7 = por %p62_p5, %p61_p4  ;;  %s311_s20 = sshll.u32 %s443_s10, 7 }
   0xc   : > { %s510_s18 = scalar_select %p46_p6, %s435_s8, %s48_s14  }
   0xd   : > { %s303_s21 = sshll.u32 %s113_s19, 3  ;;  %s128_s24 = scalar_lea.hbm %s564_s0, %s311_s20 }
   0xe   : > { %s117_s25 = scalar_lea.vmem [#allocation3], %s303_s21  ;;  %p519_p9 = pnand %p318_p8, %p497_p3 }
   0xf   : > { %s130_s26 = sshll.u32 %s117_s25, 4  ;;  %p306_p10 = scmp.ge.s32.totalorder %s447_s11, 1  ;;  %s131_s26 = int_to_ptr.vmem [resolvable:$true] %s130_s26 }
  0x10   : > { %p135_p11 = scmp.lt.s32.totalorder %s447_s11, 3  ;;  %s114_s28 = scalar_lea.sflag [#allocation4], %s113_s19 }
  0x11   : > { %p371_p12 = pneg %p519_p9  ;;  %s382_s29 = scalar_lea.vmem %s131_s26, 128 }
  0x12   : > { %p383_p13 = scmp.ne.s32.totalorder %s131_s26, %s382_s29  ;;  %s449_s30 = smov [#allocation3]  }
  0x13   : > { %s387_s2 = sshll.u32 %s449_s30, 4  ;;  %s388_s2 = int_to_ptr.vmem [resolvable:$false] %s387_s2 }
  0x14   : > { %p385_p0 = pnand %p383_p13, %p371_p12  ;;  %s389_s3 = scalar_lea.vmem %s388_s2, 256 }
  0x15   : > { %p390_p2 = scmp.lt.s32.totalorder %s131_s26, %s388_s2  ;;  %p391_p3 = scmp.lt.s32.totalorder %s389_s3, %s382_s29 }
  0x16   : > { %p386_p1 = pneg %p385_p0 }
  0x17   : > { %p392_p4 = por %p391_p3, %p390_p2 }
  0x19   : > { %p393_p5 = pnand %p392_p4, %p386_p1 }
  0x1b   : > { %396 = shalt.err (!%p393_p5)
}
  0x1c   : > { %317 = dma.hbm_to_vmem [thread:$0]  (!%p519_p9), %s128_s24, 128, %s131_s26, %s114_s28  }
  0x1d   : > { %p136_p6 = pnand %p306_p10, %p135_p11 }
  0x1e   : > { %s141_s4 = sand.u32 (!%p136_p6), 1, %s431_s7  }
  0x1f   : > { %139 = sbr.rel (%p136_p6) target bundleno = 192 (0xc0), region = 24  ;;  %s307_s5 = sshll.u32 (!%p136_p6), %s141_s4, 3 }
  0x20   : > { %s142_s6 = scalar_lea.sflag (!%p136_p6), [#allocation4], %s141_s4  ;;  %s145_s12 = scalar_lea.vmem (!%p136_p6), [#allocation3], %s307_s5 }
  0x24   : > { %422 = dma.done.wait (%p504_p7), %s142_s6, 128  }
  0x25   : > { %424 = vsyncadd (%p504_p7), %s142_s6, 4294967168  ;;  %vm183_vm0 = vcmask 3072   ;;  %v450_v0 = vmov 0.0   ;;  %vm190_vm1 = vcmask 1043456   ;;  %v185_v1 = vld [vmem:[%s145_s12] sm:$0xff]  ;;  %p173_p8 = scmp.lt.s32.totalorder %s439_s9, 1 }
  0x26   : > { %184 = vst.msk [vmem:[#allocation2] sm:$0xf] %vm183_vm0, %v450_v0  ;;  %v188_v2 = vcombine.high %v185_v1, %v185_v1  ;;  %v191_v3 = vsel %vm190_vm1, %v185_v1, 0.0 }
  0x27   : > { %s577_s9 = smov (!%p173_p8, %s439_s9), 1 }
  0x28   : > { %v192_v4 = vsel %vm190_vm1, %v188_v2, 0.0  ;;  %s308_s14 = sshll.u32 %s577_s9, 2 }
  0x29   : > { %v193_v5 = vadd.f32 %v192_v4, %v191_v3  ;;  %s178_s17 = scalar_lea.vmem %s565_s1, %s308_s14 }
  0x2b   : > { %194 = vadd.xlane.f32.xlu0 %v193_v5 }
  0x2d   : > { %v186_v6 = vld [vmem:[#allocation2] sm:$0xf] }
  0xb4   : > { %v195_v7 = vpop.xlane.xlu0 %194 }
  0xb5   : > { %v196_v8 = vadd.f32 %v195_v7, %v186_v6 }
  0xb7   : > { %198 = vst.msk [vmem:[#allocation2] sm:$0xf] %vm183_vm0, %v196_v8 }
  0xbe   : > { %v202_v9 = vld [vmem:[#allocation2] sm:$0xf] }
  0xbf   : > { %203 = vst.msk [vmem:[%s178_s17] sm:$0xf] %vm183_vm0, %v202_v9 }
  0xc0 PF: > { %s14_s11 = sadd.s32 1, %s447_s11   ;;  %s569_s6 = smov %s431_s7 }
  0xc1   : > { %p11_p7 = scmp.ge.s32.totalorder %s14_s11, 4   ;;  %s570_s7 = smov %s435_s8 }
  0xc2   : > { %s571_s8 = smov %s510_s18  ;;  %s572_s9 = smov %s443_s10 }
  0xc3   : > { %s573_s10 = smov %s575_s13  ;;  %13 = sbr.rel (!%p11_p7) target bundleno = 4 (0x4), region = 72 }
  0xc8   :  { %231 = vsyncpa [#allocation4], 1 }
  0xc9   :  { %233 = vsyncpa [#allocation4 + $0x1], 1 }

</bundles_post_ra>
